<compile_context>
chip_gen: v5e
topology: v5e:2x2
jax: 0.10.0
libtpu: 0.0.40
codegen_flags: <defaults>
</compile_context>

<pallas_src>
import functools

import jax
import jax.numpy as jnp
from jax.experimental import pallas as pl
from jax.experimental.pallas import tpu as pltpu


def _improved_gat_kernel(x_ref, bias_ref, w_ref, wa_ref, w_out_ref, b_out_ref,
                         y_ref, *, num_layers):
    x = x_ref[...]          # (N, HP)    zero-padded features
    bias = bias_ref[...]    # (N, N)     0 on edges/self-loops, -1e9 elsewhere
    w = w_ref[...]          # (HP, HP)   shared GAT weight (zero-padded)
    wa = wa_ref[...]        # (HP, HP)   col 0 = W@a_src, col 1 = W@a_dst, rest 0

    neg_slope = jnp.float32(0.2)

    out = x
    feats = [out]
    for _ in range(num_layers):
        # Two INDEPENDENT MXU matmuls (no h -> s -> d serial chain).
        h = jnp.dot(out, w, preferred_element_type=jnp.float32)     # (N, HP)
        sd = jnp.dot(out, wa, preferred_element_type=jnp.float32)   # (N, HP)
        e = sd[:, 0:1] + sd[:, 1:2].T                                # (N, N)
        e = jnp.where(e > 0, e, neg_slope * e)                       # LeakyReLU
        e = e + bias                                                 # additive mask
        e = e - jnp.max(e, axis=-1, keepdims=True)
        p = jnp.exp(e)
        inv = pl.reciprocal(jnp.sum(p, axis=-1, keepdims=True), approx=True)
        alpha = p * inv
        out = jnp.dot(alpha, h, preferred_element_type=jnp.float32)  # (N, HP)
        out = jnp.where(out > 0, out,
                        jnp.exp(jnp.minimum(out, 0.0)) - 1.0)        # ELU
        feats.append(out)

    # Fused "concat(feats) @ W_out + b": one MXU matmul with K = (L+1)*HP.
    cat = jnp.concatenate(feats, axis=-1)                            # (N, (L+1)*HP)
    y_ref[...] = (jnp.dot(cat, w_out_ref[...], preferred_element_type=jnp.float32)
                  + b_out_ref[...])


def _full_spec(shape):
    nd = len(shape)
    return pl.BlockSpec(shape, lambda *_: (0,) * nd)


_HP = 128  # lane-dense padded hidden size


@functools.partial(jax.jit, static_argnames=("num_layers",))
def improved_gat_forward(features, adj, w, a_src, a_dst, w_out, b_out,
                         num_layers):
    n, hid = features.shape
    hp = _HP
    f32 = jnp.float32

    # --- layout plumbing (fused into this jit): pad to lane-dense 128 -------
    x_p = jnp.zeros((n, hp), f32).at[:, :hid].set(features.astype(f32))
    w_p = jnp.zeros((hp, hp), f32).at[:hid, :hid].set(w)
    wa = jnp.concatenate([w @ a_src, w @ a_dst], axis=-1)            # (hid, 2)
    wa_p = jnp.zeros((hp, hp), f32).at[:hid, :2].set(wa)
    bias = jnp.where(adj > 0, jnp.float32(0.0), jnp.float32(-1e9)).astype(f32)
    w_out_p = jnp.zeros(((num_layers + 1) * hp, hp), f32)
    for l in range(num_layers + 1):
        w_out_p = w_out_p.at[l * hp:l * hp + hid, :hid].set(
            w_out[l * hid:(l + 1) * hid, :])
    b_out_p = jnp.zeros((1, hp), f32).at[:, :hid].set(b_out)

    kernel = functools.partial(_improved_gat_kernel, num_layers=num_layers)
    y_p = pl.pallas_call(
        kernel,
        out_shape=jax.ShapeDtypeStruct((n, hp), f32),
        grid=(1,),
        in_specs=[
            _full_spec((n, hp)),
            _full_spec((n, n)),
            _full_spec((hp, hp)),
            _full_spec((hp, hp)),
            _full_spec(((num_layers + 1) * hp, hp)),
            _full_spec((1, hp)),
        ],
        out_specs=_full_spec((n, hp)),
        compiler_params=pltpu.CompilerParams(
            dimension_semantics=("arbitrary",)),
    )(x_p, bias, w_p, wa_p, w_out_p, b_out_p)

    return y_p[:, :hid]


def reference_forward(features, adj, w, a_src, a_dst, w_out, b_out, num_layers):
    out = features
    feats = [out]
    for _ in range(num_layers):
        h = out @ w
        e = (h @ a_src) + (h @ a_dst).T
        e = jnp.where(e > 0, e, 0.2 * e)
        e = jnp.where(adj > 0, e, -1e9)
        alpha = jax.nn.softmax(e, axis=-1)
        out = alpha @ h
        out = jnp.where(out > 0, out, jnp.exp(jnp.minimum(out, 0.0)) - 1.0)
        feats.append(out)
    cat = jnp.concatenate(feats, axis=-1)
    return cat @ w_out + b_out


if __name__ == "__main__":
    N = 16            # number of graph nodes
    HIDESIZE = 32     # hidden feature size
    NUM_LAYERS = 2    # encoder layers (weights shared, as in the PyTorch module)

    key = jax.random.PRNGKey(0)
    k_x, k_w, k_as, k_ad, k_wo, k_bo = jax.random.split(key, 6)

    features = jax.random.normal(k_x, (N, HIDESIZE), dtype=jnp.float32)

    # edge_index: bidirectional ring graph, shape (2, 2N).
    src = jnp.arange(N, dtype=jnp.int32)
    dst = (src + 1) % N
    edge_index = jnp.stack(
        [jnp.concatenate([src, dst]), jnp.concatenate([dst, src])], axis=0)

    # Dense adjacency mask (plain-JAX glue): adj[i, j] = 1 iff edge j -> i,
    # plus self loops (standard GATConv behaviour).
    adj = jnp.zeros((N, N), dtype=jnp.float32)
    adj = adj.at[edge_index[1], edge_index[0]].set(1.0)
    adj = jnp.maximum(adj, jnp.eye(N, dtype=jnp.float32))

    # Deterministic parameter init (shapes implied by the module's __init__).
    w = jax.random.normal(k_w, (HIDESIZE, HIDESIZE), jnp.float32) / jnp.sqrt(HIDESIZE)
    a_src = jax.random.normal(k_as, (HIDESIZE, 1), jnp.float32) / jnp.sqrt(HIDESIZE)
    a_dst = jax.random.normal(k_ad, (HIDESIZE, 1), jnp.float32) / jnp.sqrt(HIDESIZE)
    # out_mlp: Linear((num_layers + 1) * hidesize, hidesize) — stored as (in, out).
    w_out = jax.random.normal(
        k_wo, ((NUM_LAYERS + 1) * HIDESIZE, HIDESIZE), jnp.float32
    ) / jnp.sqrt((NUM_LAYERS + 1) * HIDESIZE)
    b_out = jax.random.normal(k_bo, (1, HIDESIZE), jnp.float32) * 0.01

    y = improved_gat_forward(features, adj, w, a_src, a_dst, w_out, b_out,
                             NUM_LAYERS)
    y = jax.block_until_ready(y)

    y_ref = reference_forward(features, adj, w, a_src, a_dst, w_out, b_out,
                              NUM_LAYERS)
    assert y.shape == (N, HIDESIZE)
    # Tolerance accounts for the approximate (EUP) reciprocal in the softmax.
    assert jnp.allclose(y, y_ref, atol=5e-3, rtol=5e-3), "mismatch vs reference"

    print("KERNEL_OK")
</pallas_src>

<mosaic_0001>
module attributes {stable_mosaic.version = 11 : i64} {
  func.func @_improved_gat_kernel(%arg0: i32, %arg1: memref<16x128xf32, #tpu.memory_space<vmem>>, %arg2: memref<16x16xf32, #tpu.memory_space<vmem>>, %arg3: memref<128x128xf32, #tpu.memory_space<vmem>>, %arg4: memref<128x128xf32, #tpu.memory_space<vmem>>, %arg5: memref<384x128xf32, #tpu.memory_space<vmem>>, %arg6: memref<1x128xf32, #tpu.memory_space<vmem>>, %arg7: memref<16x128xf32, #tpu.memory_space<vmem>>) attributes {dimension_semantics = [#tpu.dimension_semantics<arbitrary>], iteration_bounds = array<i64: 1>, scalar_prefetch = 0 : i64, scratch_operands = 0 : i64, tpu.core_type = #tpu.core_type<tc>, window_params = [{pipeline_mode = #tpu.pipeline_mode<synchronous>, transform_indices = @transform_0, window_bounds = array<i64: 16, 128>}, {pipeline_mode = #tpu.pipeline_mode<synchronous>, transform_indices = @transform_1, window_bounds = array<i64: 16, 16>}, {pipeline_mode = #tpu.pipeline_mode<synchronous>, transform_indices = @transform_2, window_bounds = array<i64: 128, 128>}, {pipeline_mode = #tpu.pipeline_mode<synchronous>, transform_indices = @transform_3, window_bounds = array<i64: 128, 128>}, {pipeline_mode = #tpu.pipeline_mode<synchronous>, transform_indices = @transform_4, window_bounds = array<i64: 384, 128>}, {pipeline_mode = #tpu.pipeline_mode<synchronous>, transform_indices = @transform_5, window_bounds = array<i64: 1, 128>}, {pipeline_mode = #tpu.pipeline_mode<synchronous>, transform_indices = @transform_6, window_bounds = array<i64: 16, 128>}]} {
    %c0 = arith.constant 0 : index
    %c0_0 = arith.constant 0 : index
    %0 = vector.load %arg1[%c0, %c0_0] : memref<16x128xf32, #tpu.memory_space<vmem>>, vector<16x128xf32>
    %c0_1 = arith.constant 0 : index
    %c0_2 = arith.constant 0 : index
    %1 = vector.load %arg2[%c0_1, %c0_2] : memref<16x16xf32, #tpu.memory_space<vmem>>, vector<16x16xf32>
    %c0_3 = arith.constant 0 : index
    %c0_4 = arith.constant 0 : index
    %2 = vector.load %arg3[%c0_3, %c0_4] : memref<128x128xf32, #tpu.memory_space<vmem>>, vector<128x128xf32>
    %c0_5 = arith.constant 0 : index
    %c0_6 = arith.constant 0 : index
    %3 = vector.load %arg4[%c0_5, %c0_6] : memref<128x128xf32, #tpu.memory_space<vmem>>, vector<128x128xf32>
    %cst = arith.constant dense<0.000000e+00> : vector<16x128xf32>
    %4 = tpu.matmul %0, %2, %cst {dimension_numbers = #tpu.dot_dimension_numbers<[1], [0], [0], [1], [0, 0, 1, 1], [], []>} : vector<16x128xf32>, vector<128x128xf32>, vector<16x128xf32> -> vector<16x128xf32>
    %cst_7 = arith.constant dense<0.000000e+00> : vector<16x128xf32>
    %5 = tpu.matmul %0, %3, %cst_7 {dimension_numbers = #tpu.dot_dimension_numbers<[1], [0], [0], [1], [0, 0, 1, 1], [], []>} : vector<16x128xf32>, vector<128x128xf32>, vector<16x128xf32> -> vector<16x128xf32>
    %6 = vector.extract_strided_slice %5 {offsets = [0, 0], sizes = [16, 1], strides = [1, 1]} : vector<16x128xf32> to vector<16x1xf32>
    %7 = vector.extract_strided_slice %5 {offsets = [0, 1], sizes = [16, 1], strides = [1, 1]} : vector<16x128xf32> to vector<16x1xf32>
    %8 = tpu.transpose %7, [1, 0] : vector<16x1xf32> -> vector<1x16xf32>
    %9 = vector.broadcast %6 : vector<16x1xf32> to vector<16x16xf32>
    %10 = vector.broadcast %8 : vector<1x16xf32> to vector<16x16xf32>
    %11 = arith.addf %9, %10 : vector<16x16xf32>
    %cst_8 = arith.constant 0.000000e+00 : f32
    %12 = vector.broadcast %cst_8 : f32 to vector<16x16xf32>
    %13 = arith.cmpf ogt, %11, %12 : vector<16x16xf32>
    %cst_9 = arith.constant 2.000000e-01 : f32
    %14 = vector.broadcast %cst_9 : f32 to vector<16x16xf32>
    %15 = arith.mulf %14, %11 : vector<16x16xf32>
    %16 = arith.select %13, %11, %15 : vector<16x16xi1>, vector<16x16xf32>
    %17 = arith.addf %16, %1 : vector<16x16xf32>
    %cst_10 = arith.constant dense<0xFF800000> : vector<16xf32>
    %18 = vector.multi_reduction <maximumf>, %17, %cst_10 [1] : vector<16x16xf32> to vector<16xf32>
    %19 = vector.shape_cast %18 : vector<16xf32> to vector<16x1xf32>
    %20 = vector.broadcast %19 : vector<16x1xf32> to vector<16x16xf32>
    %21 = arith.subf %17, %20 : vector<16x16xf32>
    %22 = math.exp %21 : vector<16x16xf32>
    %cst_11 = arith.constant dense<0.000000e+00> : vector<16xf32>
    %23 = vector.multi_reduction <add>, %22, %cst_11 [1] : vector<16x16xf32> to vector<16xf32>
    %24 = vector.shape_cast %23 : vector<16xf32> to vector<16x1xf32>
    %25 = tpu.reciprocal %24 {approx = true} : vector<16x1xf32> -> vector<16x1xf32>
    %26 = vector.broadcast %25 : vector<16x1xf32> to vector<16x16xf32>
    %27 = arith.mulf %22, %26 : vector<16x16xf32>
    %cst_12 = arith.constant dense<0.000000e+00> : vector<16x128xf32>
    %28 = tpu.matmul %27, %4, %cst_12 {dimension_numbers = #tpu.dot_dimension_numbers<[1], [0], [0], [1], [0, 0, 1, 1], [], []>} : vector<16x16xf32>, vector<16x128xf32>, vector<16x128xf32> -> vector<16x128xf32>
    %cst_13 = arith.constant 0.000000e+00 : f32
    %29 = vector.broadcast %cst_13 : f32 to vector<16x128xf32>
    %30 = arith.cmpf ogt, %28, %29 : vector<16x128xf32>
    %cst_14 = arith.constant 0.000000e+00 : f32
    %31 = vector.broadcast %cst_14 : f32 to vector<16x128xf32>
    %32 = arith.minimumf %28, %31 : vector<16x128xf32>
    %33 = math.exp %32 : vector<16x128xf32>
    %cst_15 = arith.constant 1.000000e+00 : f32
    %34 = vector.broadcast %cst_15 : f32 to vector<16x128xf32>
    %35 = arith.subf %33, %34 : vector<16x128xf32>
    %36 = arith.select %30, %28, %35 : vector<16x128xi1>, vector<16x128xf32>
    %cst_16 = arith.constant dense<0.000000e+00> : vector<16x128xf32>
    %37 = tpu.matmul %36, %2, %cst_16 {dimension_numbers = #tpu.dot_dimension_numbers<[1], [0], [0], [1], [0, 0, 1, 1], [], []>} : vector<16x128xf32>, vector<128x128xf32>, vector<16x128xf32> -> vector<16x128xf32>
    %cst_17 = arith.constant dense<0.000000e+00> : vector<16x128xf32>
    %38 = tpu.matmul %36, %3, %cst_17 {dimension_numbers = #tpu.dot_dimension_numbers<[1], [0], [0], [1], [0, 0, 1, 1], [], []>} : vector<16x128xf32>, vector<128x128xf32>, vector<16x128xf32> -> vector<16x128xf32>
    %39 = vector.extract_strided_slice %38 {offsets = [0, 0], sizes = [16, 1], strides = [1, 1]} : vector<16x128xf32> to vector<16x1xf32>
    %40 = vector.extract_strided_slice %38 {offsets = [0, 1], sizes = [16, 1], strides = [1, 1]} : vector<16x128xf32> to vector<16x1xf32>
    %41 = tpu.transpose %40, [1, 0] : vector<16x1xf32> -> vector<1x16xf32>
    %42 = vector.broadcast %39 : vector<16x1xf32> to vector<16x16xf32>
    %43 = vector.broadcast %41 : vector<1x16xf32> to vector<16x16xf32>
    %44 = arith.addf %42, %43 : vector<16x16xf32>
    %cst_18 = arith.constant 0.000000e+00 : f32
    %45 = vector.broadcast %cst_18 : f32 to vector<16x16xf32>
    %46 = arith.cmpf ogt, %44, %45 : vector<16x16xf32>
    %cst_19 = arith.constant 2.000000e-01 : f32
    %47 = vector.broadcast %cst_19 : f32 to vector<16x16xf32>
    %48 = arith.mulf %47, %44 : vector<16x16xf32>
    %49 = arith.select %46, %44, %48 : vector<16x16xi1>, vector<16x16xf32>
    %50 = arith.addf %49, %1 : vector<16x16xf32>
    %cst_20 = arith.constant dense<0xFF800000> : vector<16xf32>
    %51 = vector.multi_reduction <maximumf>, %50, %cst_20 [1] : vector<16x16xf32> to vector<16xf32>
    %52 = vector.shape_cast %51 : vector<16xf32> to vector<16x1xf32>
    %53 = vector.broadcast %52 : vector<16x1xf32> to vector<16x16xf32>
    %54 = arith.subf %50, %53 : vector<16x16xf32>
    %55 = math.exp %54 : vector<16x16xf32>
    %cst_21 = arith.constant dense<0.000000e+00> : vector<16xf32>
    %56 = vector.multi_reduction <add>, %55, %cst_21 [1] : vector<16x16xf32> to vector<16xf32>
    %57 = vector.shape_cast %56 : vector<16xf32> to vector<16x1xf32>
    %58 = tpu.reciprocal %57 {approx = true} : vector<16x1xf32> -> vector<16x1xf32>
    %59 = vector.broadcast %58 : vector<16x1xf32> to vector<16x16xf32>
    %60 = arith.mulf %55, %59 : vector<16x16xf32>
    %cst_22 = arith.constant dense<0.000000e+00> : vector<16x128xf32>
    %61 = tpu.matmul %60, %37, %cst_22 {dimension_numbers = #tpu.dot_dimension_numbers<[1], [0], [0], [1], [0, 0, 1, 1], [], []>} : vector<16x16xf32>, vector<16x128xf32>, vector<16x128xf32> -> vector<16x128xf32>
    %cst_23 = arith.constant 0.000000e+00 : f32
    %62 = vector.broadcast %cst_23 : f32 to vector<16x128xf32>
    %63 = arith.cmpf ogt, %61, %62 : vector<16x128xf32>
    %cst_24 = arith.constant 0.000000e+00 : f32
    %64 = vector.broadcast %cst_24 : f32 to vector<16x128xf32>
    %65 = arith.minimumf %61, %64 : vector<16x128xf32>
    %66 = math.exp %65 : vector<16x128xf32>
    %cst_25 = arith.constant 1.000000e+00 : f32
    %67 = vector.broadcast %cst_25 : f32 to vector<16x128xf32>
    %68 = arith.subf %66, %67 : vector<16x128xf32>
    %69 = arith.select %63, %61, %68 : vector<16x128xi1>, vector<16x128xf32>
    %70 = tpu.concatenate %0, %36, %69 in 1 : vector<16x128xf32>, vector<16x128xf32>, vector<16x128xf32> -> vector<16x384xf32>
    %c0_26 = arith.constant 0 : index
    %c0_27 = arith.constant 0 : index
    %71 = vector.load %arg5[%c0_26, %c0_27] : memref<384x128xf32, #tpu.memory_space<vmem>>, vector<384x128xf32>
    %cst_28 = arith.constant dense<0.000000e+00> : vector<16x128xf32>
    %72 = tpu.matmul %70, %71, %cst_28 {dimension_numbers = #tpu.dot_dimension_numbers<[1], [0], [0], [1], [0, 0, 1, 1], [], []>} : vector<16x384xf32>, vector<384x128xf32>, vector<16x128xf32> -> vector<16x128xf32>
    %c0_29 = arith.constant 0 : index
    %c0_30 = arith.constant 0 : index
    %73 = vector.load %arg6[%c0_29, %c0_30] : memref<1x128xf32, #tpu.memory_space<vmem>>, vector<1x128xf32>
    %74 = vector.broadcast %73 : vector<1x128xf32> to vector<16x128xf32>
    %75 = arith.addf %72, %74 : vector<16x128xf32>
    %c0_31 = arith.constant 0 : index
    %c0_32 = arith.constant 0 : index
    %76 = vector.load %arg7[%c0_31, %c0_32] : memref<16x128xf32, #tpu.memory_space<vmem>>, vector<16x128xf32>
    tpu.vector_store %arg7[%c0_31, %c0_32], %75 {strides = array<i32>} : memref<16x128xf32, #tpu.memory_space<vmem>>, vector<16x128xf32>,
    return
  }
  func.func @transform_0(%arg0: i32) -> (i32, i32) {
    %c0_i32 = arith.constant 0 : i32
    %c0_i32_0 = arith.constant 0 : i32
    %c0_i32_1 = arith.constant 0 : i32
    return %c0_i32, %c0_i32_0 : i32, i32
  }
  func.func @transform_1(%arg0: i32) -> (i32, i32) {
    %c0_i32 = arith.constant 0 : i32
    %c0_i32_0 = arith.constant 0 : i32
    %c0_i32_1 = arith.constant 0 : i32
    return %c0_i32, %c0_i32_0 : i32, i32
  }
  func.func @transform_2(%arg0: i32) -> (i32, i32) {
    %c0_i32 = arith.constant 0 : i32
    %c0_i32_0 = arith.constant 0 : i32
    %c0_i32_1 = arith.constant 0 : i32
    return %c0_i32, %c0_i32_0 : i32, i32
  }
  func.func @transform_3(%arg0: i32) -> (i32, i32) {
    %c0_i32 = arith.constant 0 : i32
    %c0_i32_0 = arith.constant 0 : i32
    %c0_i32_1 = arith.constant 0 : i32
    return %c0_i32, %c0_i32_0 : i32, i32
  }
  func.func @transform_4(%arg0: i32) -> (i32, i32) {
    %c0_i32 = arith.constant 0 : i32
    %c0_i32_0 = arith.constant 0 : i32
    %c0_i32_1 = arith.constant 0 : i32
    return %c0_i32, %c0_i32_0 : i32, i32
  }
  func.func @transform_5(%arg0: i32) -> (i32, i32) {
    %c0_i32 = arith.constant 0 : i32
    %c0_i32_0 = arith.constant 0 : i32
    %c0_i32_1 = arith.constant 0 : i32
    return %c0_i32, %c0_i32_0 : i32, i32
  }
  func.func @transform_6(%arg0: i32) -> (i32, i32) {
    %c0_i32 = arith.constant 0 : i32
    %c0_i32_0 = arith.constant 0 : i32
    %c0_i32_1 = arith.constant 0 : i32
    return %c0_i32, %c0_i32_0 : i32, i32
  }
}

</mosaic_0001>

<bundles_post_ra>
// kernel: improved_gat_forward.1
= control target key start
LH: loop header
LB: loop body
LE: loop exit
PB: predicated region body
PF: predicated region fallthrough
CT: control target
= control target key end

     0   :  { %s937_s0 = inlined_call_operand.vmem [shape: f32[16,128], index: 0, kind: input, shape index: {}]   ;;  %s938_s1 = inlined_call_operand.vmem [shape: f32[16,16], index: 1, kind: input, shape index: {}]   ;;  %s939_s2 = inlined_call_operand.vmem [shape: f32[128,128], index: 2, kind: input, shape index: {}]   ;;  %s940_s3 = inlined_call_operand.vmem [shape: f32[128,128], index: 3, kind: input, shape index: {}]   ;;  %s941_s4 = inlined_call_operand.vmem [shape: f32[384,128], index: 4, kind: input, shape index: {}]   ;;  %s942_s5 = inlined_call_operand.vmem [shape: f32[1,128], index: 5, kind: input, shape index: {}]   ;;  %s943_s6 = inlined_call_operand.hbm [shape: f32[16,128], index: 6, kind: output, shape index: {}]  }
   0x1   :  { %v59_v0 = vld [vmem:[%s940_s3 + $0x78] sm:$0xff]  ;;  %v58_v1 = vld [vmem:[%s940_s3 + $0x70] sm:$0xff]  ;;  %v57_v2 = vld [vmem:[%s940_s3 + $0x68] sm:$0xff] }
   0x2   :  { %83 = vmatpush.msra.mxu1 %v59_v0  ;;  %252 = vmatpush.msra.mxu2 %v59_v0  ;;  %v56_v3 = vld [vmem:[%s940_s3 + $0x60] sm:$0xff]  ;;  %v55_v4 = vld [vmem:[%s940_s3 + $0x58] sm:$0xff] }
   0x4   :  { %84 = vmatpush.msra.mxu1 %v58_v1  ;;  %253 = vmatpush.msra.mxu2 %v58_v1 }
   0x6   :  { %85 = vmatpush.msra.mxu1 %v57_v2  ;;  %254 = vmatpush.msra.mxu2 %v57_v2 }
   0x7   :  { %11 = vsyncpa [#allocation3], 0  ;;  %v54_v5 = vld [vmem:[%s940_s3 + $0x50] sm:$0xff]  ;;  %v605_v6 = vmov 0   ;;  %v53_v7 = vld [vmem:[%s940_s3 + $0x48] sm:$0xff]  ;;  %vm165_vm2 = vcmask 130048  }
   0x8   :  { %86 = vmatpush.msra.mxu1 %v56_v3  ;;  %255 = vmatpush.msra.mxu2 %v56_v3  ;;  %v52_v8 = vld [vmem:[%s940_s3 + $0x40] sm:$0xff]  ;;  %v51_v9 = vld [vmem:[%s940_s3 + $0x38] sm:$0xff]  ;;  %v50_v10 = vld [vmem:[%s940_s3 + $0x30] sm:$0xff]  ;;  %s607_s7 = smov [#allocation2]   ;;  %s609_s11 = smov 8  }
   0x9   :  { %552 = vset.pattern.permute.xlu1 %v605_v6  ;;  %553 = vset.pattern.permute.xlu0 %v605_v6  ;;  %v49_v11 = vld [vmem:[%s940_s3 + $0x28] sm:$0xff]  ;;  %v48_v12 = vld [vmem:[%s940_s3 + $0x20] sm:$0xff]  ;;  %v47_v13 = vld [vmem:[%s940_s3 + $0x18] sm:$0xff]  ;;  %s524_s8 = sshll.u32 %s607_s7, 4  ;;  %s525_s8 = int_to_ptr.vmem [resolvable:$true] %s524_s8 }
   0xa   :  { %87 = vmatpush.msra.mxu1 %v55_v4  ;;  %256 = vmatpush.msra.mxu2 %v55_v4  ;;  %v46_v14 = vld [vmem:[%s940_s3 + $0x10] sm:$0xff]  ;;  %v45_v15 = vld [vmem:[%s940_s3 + $0x8] sm:$0xff]  ;;  %v44_v16 = vld [vmem:[%s940_s3] sm:$0xff]  ;;  %s606_s3 = smov 127  }
   0xb   :  { %v696_v17 = vld [vmem:[%s937_s0] sm:$0xff]  ;;  %v702_v18 = vld [vmem:[%s937_s0 + $0x8] sm:$0xff]  ;;  %v43_v23 = vld [vmem:[%s939_s2 + $0x78] sm:$0xff]  ;;  %s526_s0 = sshll.u32 %s943_s6, 4  ;;  %s527_s0 = int_to_ptr.hbm [resolvable:$true] %s526_s0 }
   0xc   :  { %88 = vmatpush.msra.mxu1 %v54_v5  ;;  %257 = vmatpush.msra.mxu2 %v54_v5  ;;  %v42_v24 = vld [vmem:[%s939_s2 + $0x70] sm:$0xff]  ;;  %v41_v25 = vld [vmem:[%s939_s2 + $0x68] sm:$0xff]  ;;  %v40_v26 = vld [vmem:[%s939_s2 + $0x60] sm:$0xff] }
   0xd   :  { %60 = vmatpush.msra.mxu0 %v43_v23  ;;  %229 = vmatpush.msra.mxu3 %v43_v23  ;;  %v39_v27 = vld [vmem:[%s939_s2 + $0x58] sm:$0xff]  ;;  %v38_v28 = vld [vmem:[%s939_s2 + $0x50] sm:$0xff]  ;;  %v37_v29 = vld [vmem:[%s939_s2 + $0x48] sm:$0xff] }
   0xe   :  { %89 = vmatpush.msra.mxu1 %v53_v7  ;;  %258 = vmatpush.msra.mxu2 %v53_v7  ;;  %v36_v30 = vld [vmem:[%s939_s2 + $0x40] sm:$0xff]  ;;  %v35_v32 = vld [vmem:[%s939_s2 + $0x38] sm:$0xff]  ;;  %v34_v33 = vld [vmem:[%s939_s2 + $0x30] sm:$0xff] }
   0xf   :  { %61 = vmatpush.msra.mxu0 %v42_v24  ;;  %230 = vmatpush.msra.mxu3 %v42_v24  ;;  %v33_v34 = vld [vmem:[%s939_s2 + $0x28] sm:$0xff]  ;;  %v32_v35 = vld [vmem:[%s939_s2 + $0x20] sm:$0xff]  ;;  %v31_v38 = vld [vmem:[%s939_s2 + $0x18] sm:$0xff] }
  0x10   :  { %90 = vmatpush.msra.mxu1 %v52_v8  ;;  %259 = vmatpush.msra.mxu2 %v52_v8  ;;  %v30_v42 = vld [vmem:[%s939_s2 + $0x10] sm:$0xff]  ;;  %v752_v43 = vld [vmem:[%s938_s1 + $0x8] sm:$0xff]  ;;  %v757_v44 = vld [vmem:[%s938_s1] sm:$0xff] }
  0x11   :  { %62 = vmatpush.msra.mxu0 %v41_v25  ;;  %231 = vmatpush.msra.mxu3 %v41_v25  ;;  %v29_v45 = vld [vmem:[%s939_s2 + $0x8] sm:$0xff]  ;;  %v28_v50 = vld [vmem:[%s939_s2] sm:$0xff]  ;;  %v407_v23 = vld [vmem:[%s941_s4 + $0x50] sm:$0xff] }
  0x12   :  { %91 = vmatpush.msra.mxu1 %v51_v9  ;;  %260 = vmatpush.msra.mxu2 %v51_v9  ;;  %v428_v9 = vld [vmem:[%s941_s4 + $0xf8] sm:$0xff]  ;;  %v421_v24 = vld [vmem:[%s941_s4 + $0xc0] sm:$0xff]  ;;  %v406_v25 = vld [vmem:[%s941_s4 + $0x48] sm:$0xff] }
  0x13   :  { %63 = vmatpush.msra.mxu0 %v40_v26  ;;  %232 = vmatpush.msra.mxu3 %v40_v26  ;;  %v420_v26 = vld [vmem:[%s941_s4 + $0xb8] sm:$0xff] }
  0x14   :  { %92 = vmatpush.msra.mxu1 %v50_v10  ;;  %261 = vmatpush.msra.mxu2 %v50_v10  ;;  %v427_v10 = vld [vmem:[%s941_s4 + $0xf0] sm:$0xff] }
  0x15   :  { %64 = vmatpush.msra.mxu0 %v39_v27  ;;  %233 = vmatpush.msra.mxu3 %v39_v27  ;;  %v405_v27 = vld [vmem:[%s941_s4 + $0x40] sm:$0xff] }
  0x16   :  { %93 = vmatpush.msra.mxu1 %v49_v11  ;;  %262 = vmatpush.msra.mxu2 %v49_v11  ;;  %v412_v11 = vld [vmem:[%s941_s4 + $0x78] sm:$0xff] }
  0x17   :  { %65 = vmatpush.msra.mxu0 %v38_v28  ;;  %234 = vmatpush.msra.mxu3 %v38_v28  ;;  %v419_v28 = vld [vmem:[%s941_s4 + $0xb0] sm:$0xff] }
  0x18   :  { %94 = vmatpush.msra.mxu1 %v48_v12  ;;  %263 = vmatpush.msra.mxu2 %v48_v12  ;;  %v426_v12 = vld [vmem:[%s941_s4 + $0xe8] sm:$0xff] }
  0x19   :  { %66 = vmatpush.msra.mxu0 %v37_v29  ;;  %235 = vmatpush.msra.mxu3 %v37_v29  ;;  %v404_v29 = vld [vmem:[%s941_s4 + $0x38] sm:$0xff] }
  0x1a   :  { %95 = vmatpush.msra.mxu1 %v47_v13  ;;  %264 = vmatpush.msra.mxu2 %v47_v13  ;;  %v411_v13 = vld [vmem:[%s941_s4 + $0x70] sm:$0xff] }
  0x1b   :  { %67 = vmatpush.msra.mxu0 %v36_v30  ;;  %236 = vmatpush.msra.mxu3 %v36_v30  ;;  %v418_v30 = vld [vmem:[%s941_s4 + $0xa8] sm:$0xff] }
  0x1c   :  { %96 = vmatpush.msra.mxu1 %v46_v14  ;;  %265 = vmatpush.msra.mxu2 %v46_v14  ;;  %v425_v14 = vld [vmem:[%s941_s4 + $0xe0] sm:$0xff] }
  0x1d   :  { %68 = vmatpush.msra.mxu0 %v35_v32  ;;  %237 = vmatpush.msra.mxu3 %v35_v32  ;;  %v417_v32 = vld [vmem:[%s941_s4 + $0xa0] sm:$0xff] }
  0x1e   :  { %97 = vmatpush.msra.mxu1 %v45_v15  ;;  %266 = vmatpush.msra.mxu2 %v45_v15  ;;  %v410_v15 = vld [vmem:[%s941_s4 + $0x68] sm:$0xff] }
  0x1f   :  { %69 = vmatpush.msra.mxu0 %v34_v33  ;;  %238 = vmatpush.msra.mxu3 %v34_v33  ;;  %v402_v33 = vld [vmem:[%s941_s4 + $0x28] sm:$0xff] }
  0x20   :  { %98 = vmatpush.msra.mxu1 %v44_v16  ;;  %267 = vmatpush.msra.mxu2 %v44_v16  ;;  %v424_v16 = vld [vmem:[%s941_s4 + $0xd8] sm:$0xff] }
  0x21   :  { %99 = vmatmul.f32.vlgmr.msra.gmra.mxu1 %v696_v17  ;;  %70 = vmatpush.msra.mxu0 %v33_v34 }
  0x22   :  { %239 = vmatpush.msra.mxu3 %v33_v34  ;;  %449 = vmatpush.msrb.mxu1 %v412_v11  ;;  %v416_v34 = vld [vmem:[%s941_s4 + $0x98] sm:$0xff] }
  0x23   :  { %71 = vmatpush.msra.mxu0 %v32_v35 }
  0x24   :  { %240 = vmatpush.msra.mxu3 %v32_v35  ;;  %450 = vmatpush.msrb.mxu1 %v411_v13  ;;  %v401_v35 = vld [vmem:[%s941_s4 + $0x20] sm:$0xff] }
  0x25   :  { %72 = vmatpush.msra.mxu0 %v31_v38 }
  0x26   :  { %241 = vmatpush.msra.mxu3 %v31_v38  ;;  %451 = vmatpush.msrb.mxu1 %v410_v15  ;;  %v414_v38 = vld [vmem:[%s941_s4 + $0x88] sm:$0xff] }
  0x27   :  { %73 = vmatpush.msra.mxu0 %v30_v42 }
  0x28   :  { %242 = vmatpush.msra.mxu3 %v30_v42  ;;  %v397_v42 = vld [vmem:[%s941_s4] sm:$0xff] }
  0x29   :  { %102 = vmatmul.f32.gmra.mxu1 %v702_v18  ;;  %74 = vmatpush.msra.mxu0 %v29_v45 }
  0x2a   :  { %243 = vmatpush.msra.mxu3 %v29_v45 }
  0x2b   :  { %75 = vmatpush.msra.mxu0 %v28_v50 }
  0x2c   :  { %244 = vmatpush.msra.mxu3 %v28_v50  ;;  %76 = vmatmul.f32.vlgmr.msra.gmra.mxu0 %v696_v17 }
  0x2e   :  { %472 = vmatpush.msrb.mxu3 %v428_v9 }
  0x30   :  { %473 = vmatpush.msrb.mxu3 %v427_v10 }
  0x32   :  { %474 = vmatpush.msrb.mxu3 %v426_v12 }
  0x34   :  { %79 = vmatmul.f32.gmra.mxu0 %v702_v18  ;;  %475 = vmatpush.msrb.mxu3 %v425_v14 }
  0x36   :  { %476 = vmatpush.msrb.mxu3 %v424_v16 }
  0x9e   :  { %v100_v19 = vpop.f32.mrf.mxu1 }
  0x9f   :  { %147 = vperm.xlu1 %552, %v100_v19   ;;  %108 = vrot.lane.b32.xlu0 %v100_v19, %s606_s3  ;;  %v409_v19 = vld [vmem:[%s941_s4 + $0x60] sm:$0xff] }
  0xa0   :  { %452 = vmatpush.msrb.mxu1 %v409_v19 }
  0xa6   :  { %v103_v20 = vpop.f32.mrf.mxu1 }
  0xa7   :  { %151 = vperm.xlu1 %552, %v103_v20   ;;  %110 = vrot.lane.b32.xlu0 %v103_v20, %s606_s3  ;;  %v423_v20 = vld [vmem:[%s941_s4 + $0xd0] sm:$0xff] }
  0xa8   :  { %477 = vmatpush.msrb.mxu3 %v423_v20 }
  0xa9   :  { %v77_v62 = vpop.f32.mrf.mxu0 }
  0xb1   :  { %v80_v2 = vpop.f32.mrf.mxu0 }
  0xb2   :  { %208 = vmatpush.msrb.mxu0 %v80_v2 }
  0xb4   :  { %209 = vmatpush.msrb.mxu0 %v77_v62 }
 0x111   :  { %v109_v21 = vpop.permute.xlu0 %108  ;;  %v148_v31 = vpop.permute.xlu1 %147 }
 0x112   :  { %114 = vxpose.xlu2.b32.start [1/2] (short) (narrow) %v109_v21, 8  ;;  %v408_v21 = vld [vmem:[%s941_s4 + $0x58] sm:$0xff] }
 0x113   :  { %453 = vmatpush.msrb.mxu1 %v408_v21  ;;  %v444_v21 = vld [vmem:[%s941_s4 + $0x178] sm:$0xff] }
 0x114   :  { %495 = vmatpush.msrb.mxu2 %v444_v21 }
 0x115   :  { %454 = vmatpush.msrb.mxu1 %v407_v23  ;;  %v442_v23 = vld [vmem:[%s941_s4 + $0x168] sm:$0xff] }
 0x117   :  { %455 = vmatpush.msrb.mxu1 %v406_v25  ;;  %v440_v25 = vld [vmem:[%s941_s4 + $0x158] sm:$0xff] }
 0x119   :  { %v111_v22 = vpop.permute.xlu0 %110  ;;  %v152_v39 = vpop.permute.xlu1 %151  ;;  %456 = vmatpush.msrb.mxu1 %v405_v27  ;;  %v438_v27 = vld [vmem:[%s941_s4 + $0x148] sm:$0xff] }
 0x11a   :  { %115 = vxpose.xlu2.b32.end [2/2] (short) (narrow) %v111_v22, 8  ;;  %v422_v22 = vld [vmem:[%s941_s4 + $0xc8] sm:$0xff] }
 0x11b   :  { %478 = vmatpush.msrb.mxu3 %v422_v22  ;;  %457 = vmatpush.msrb.mxu1 %v404_v29  ;;  %v443_v22 = vld [vmem:[%s941_s4 + $0x170] sm:$0xff] }
 0x11c   :  { %496 = vmatpush.msrb.mxu2 %v443_v22 }
 0x11d   :  { %479 = vmatpush.msrb.mxu3 %v421_v24  ;;  %v441_v24 = vld [vmem:[%s941_s4 + $0x160] sm:$0xff] }
 0x11e   :  { %497 = vmatpush.msrb.mxu2 %v442_v23 }
 0x11f   :  { %480 = vmatpush.msrb.mxu3 %v420_v26  ;;  %v439_v26 = vld [vmem:[%s941_s4 + $0x150] sm:$0xff] }
 0x120   :  { %498 = vmatpush.msrb.mxu2 %v441_v24 }
 0x121   :  { %481 = vmatpush.msrb.mxu3 %v419_v28  ;;  %v437_v28 = vld [vmem:[%s941_s4 + $0x140] sm:$0xff] }
 0x122   :  { %499 = vmatpush.msrb.mxu2 %v440_v25 }
 0x123   :  { %482 = vmatpush.msrb.mxu3 %v418_v30 }
 0x124   :  { %500 = vmatpush.msrb.mxu2 %v439_v26 }
 0x125   :  { %483 = vmatpush.msrb.mxu3 %v417_v32 }
 0x126   :  { %501 = vmatpush.msrb.mxu2 %v438_v27 }
 0x127   :  { %484 = vmatpush.msrb.mxu3 %v416_v34 }
 0x128   :  { %502 = vmatpush.msrb.mxu2 %v437_v28 }
 0x1ab   :  { %v130_v36 = vpop.trf.xlu2 }
 0x1ac   :  { %v154_v37 = vperm.slane %v130_v36, 0  ;;  %v415_v36 = vld [vmem:[%s941_s4 + $0x90] sm:$0xff] }
 0x1ad   :  { %485 = vmatpush.msrb.mxu3 %v415_v36  ;;  %v435_v36 = vld [vmem:[%s941_s4 + $0x130] sm:$0xff] }
 0x1ae   :  { %v155_v40 = vadd.f32 %v154_v37, %v148_v31  ;;  %v156_v41 = vadd.f32 %v154_v37, %v152_v39  ;;  %v403_v31 = vld [vmem:[%s941_s4 + $0x30] sm:$0xff]  ;;  %v400_v37 = vld [vmem:[%s941_s4 + $0x18] sm:$0xff] }
 0x1af   :  { %458 = vmatpush.msrb.mxu1 %v403_v31  ;;  %v399_v39 = vld [vmem:[%s941_s4 + $0x10] sm:$0xff]  ;;  %486 = vmatpush.msrb.mxu3 %v414_v38  ;;  %v433_v38 = vld [vmem:[%s941_s4 + $0x120] sm:$0xff] }
 0x1b0   :  { %v159_v46 = vmul.f32 0.2, %v155_v40  ;;  %v160_v47 = vmul.f32 0.2, %v156_v41  ;;  %vm158_vm0 = vcmp.gt.f32.partialorder %v156_v41, 0.0  ;;  %vm157_vm1 = vcmp.gt.f32.partialorder %v155_v40, 0.0 }
 0x1b1   :  { %459 = vmatpush.msrb.mxu1 %v402_v33 }
 0x1b2   :  { %v162_v48 = vsel %vm158_vm0, %v156_v41, %v160_v47  ;;  %v161_v49 = vsel %vm157_vm1, %v155_v40, %v159_v46  ;;  %v413_v40 = vld [vmem:[%s941_s4 + $0x80] sm:$0xff]  ;;  %v398_v41 = vld [vmem:[%s941_s4 + $0x8] sm:$0xff] }
 0x1b3   :  { %v164_v51 = vadd.f32 %v162_v48, %v752_v43  ;;  %v163_v52 = vadd.f32 %v161_v49, %v757_v44  ;;  %460 = vmatpush.msrb.mxu1 %v401_v35  ;;  %487 = vmatpush.msrb.mxu3 %v413_v40  ;;  %v436_v35 = vld [vmem:[%s941_s4 + $0x138] sm:$0xff]  ;;  %v431_v40 = vld [vmem:[%s941_s4 + $0x110] sm:$0xff] }
 0x1b4   :  { %503 = vmatpush.msrb.mxu2 %v436_v35 }
 0x1b5   :  { %v169_v53 = vsel %vm165_vm2, %v164_v51, -inf  ;;  %v166_v54 = vsel %vm165_vm2, %v163_v52, -inf  ;;  %461 = vmatpush.msrb.mxu1 %v400_v37  ;;  %v434_v37 = vld [vmem:[%s941_s4 + $0x128] sm:$0xff] }
 0x1b6   :  { %170 = vmax.xlane.f32.xlu1 %v169_v53  ;;  %167 = vmax.xlane.f32.xlu0 %v166_v54 }
 0x1b7   :  { %462 = vmatpush.msrb.mxu1 %v399_v39  ;;  %504 = vmatpush.msrb.mxu2 %v435_v36  ;;  %v432_v39 = vld [vmem:[%s941_s4 + $0x118] sm:$0xff] }
 0x1b9   :  { %463 = vmatpush.msrb.mxu1 %v398_v41  ;;  %505 = vmatpush.msrb.mxu2 %v434_v37  ;;  %v430_v41 = vld [vmem:[%s941_s4 + $0x108] sm:$0xff] }
 0x1bb   :  { %464 = vmatpush.msrb.mxu1 %v397_v42  ;;  %506 = vmatpush.msrb.mxu2 %v433_v38  ;;  %v429_v42 = vld [vmem:[%s941_s4 + $0x100] sm:$0xff] }
 0x1bc   :  { %465 = vmatmul.f32.vlgmr.msrb.gmra.mxu1 %v696_v17 }
 0x1bd   :  { %507 = vmatpush.msrb.mxu2 %v432_v39 }
 0x1bf   :  { %508 = vmatpush.msrb.mxu2 %v431_v40 }
 0x1c1   :  { %509 = vmatpush.msrb.mxu2 %v430_v41 }
 0x1c3   :  { %510 = vmatpush.msrb.mxu2 %v429_v42 }
 0x1c4   :  { %468 = vmatmul.f32.gmra.mxu1 %v702_v18 }
 0x229   :  { %v171_v55 = vpop.xlane.xlu1 %170  ;;  %v168_v56 = vpop.xlane.xlu0 %167 }
 0x22a   :  { %v173_v57 = vsub.f32 %v164_v51, %v171_v55  ;;  %v172_v58 = vsub.f32 %v163_v52, %v168_v56 }
 0x22c   :  { %v176_v59 = vmul.f32 1.442695, %v173_v57  ;;  %v174_v60 = vmul.f32 1.442695, %v172_v58 }
 0x22e   :  { %555 = vpow2.f32 %v176_v59 }
 0x22f   :  { %557 = vpow2.f32 %v174_v60 }
 0x234   :  { %v556_v61 = vpop.eup %555 }
 0x235   :  { %v558_v63 = vpop.eup %557  ;;  %v181_v0 = vsel %vm165_vm2, %v556_v61, 0.0 }
 0x236   :  { %182 = vadd.xlane.f32.xlu0 %v181_v0  ;;  %v178_v1 = vsel %vm165_vm2, %v558_v63, 0.0 }
 0x237   :  { %179 = vadd.xlane.f32.xlu2 %v178_v1 }
 0x2a9   :  { %v183_v4 = vpop.xlane.xlu0 %182 }
 0x2aa   :  { %v180_v3 = vpop.xlane.xlu2 %179 }
 0x2ab   :  { %559 = vrcp.f32 %v180_v3 }
 0x2ac   :  { %561 = vrcp.f32 %v183_v4 }
 0x2b1   :  { %v560_v5 = vpop.eup %559 }
 0x2b2   :  { %v186_v6 = vmul.f32 %v560_v5, %v558_v63  ;;  %v562_v7 = vpop.eup %561 }
 0x2b3   :  { %v187_v8 = vmul.f32 %v562_v7, %v556_v61 }
 0x2b4   :  { %538 = vmatmul.msk.f32.vlgmr.msrb.gmra.mxu0 %vm165_vm2, %v186_v6 }
 0x2bc   :  { %539 = vmatmul.msk.f32.gmra.mxu0 %vm165_vm2, %v187_v8 }
 0x331   :  { %v211_v45 = vpop.f32.mrf.mxu0 }
 0x332   :  { %v219_v46 = vmin.f32 %v211_v45, 0.0  ;;  %vm217_vm3 = vcmp.gt.f32.partialorder %v211_v45, 0.0 }
 0x334   :  { %v221_v47 = vmul.f32 1.442695, %v219_v46 }
 0x336   :  { %563 = vpow2.f32 %v221_v47 }
 0x339   :  { %v214_v48 = vpop.f32.mrf.mxu0 }
 0x33a   :  { %v220_v49 = vmin.f32 %v214_v48, 0.0  ;;  %vm218_vm4 = vcmp.gt.f32.partialorder %v214_v48, 0.0 }
 0x33c   :  { %v564_v50 = vpop.eup %563  ;;  %v223_v51 = vmul.f32 1.442695, %v220_v49 }
 0x33d   :  { %v540_v52 = vadd.f32 -1.0, %v564_v50 }
 0x33e   :  { %565 = vpow2.f32 %v223_v51 }
 0x33f   :  { %v227_v53 = vsel %vm217_vm3, %v211_v45, %v540_v52 }
 0x340   :  { %245 = vmatmul.f32.vlgmr.msra.gmra.mxu3 %v227_v53  ;;  %268 = vmatmul.f32.vlgmr.msra.gmra.mxu2 %v227_v53 }
 0x344   :  { %v566_v54 = vpop.eup %565 }
 0x345   :  { %v541_v55 = vadd.f32 -1.0, %v566_v54 }
 0x347   :  { %v228_v56 = vsel %vm218_vm4, %v214_v48, %v541_v55 }
 0x348   :  { %248 = vmatmul.f32.gmra.mxu3 %v228_v56  ;;  %271 = vmatmul.f32.gmra.mxu2 %v228_v56 }
 0x350   :  { %488 = vmatmul.f32.vlgmr.msrb.gmra.mxu3 %v227_v53 }
 0x358   :  { %491 = vmatmul.f32.gmra.mxu3 %v228_v56 }
 0x3c3   :  { %v246_v17 = vpop.f32.mrf.mxu3  ;;  %v269_v57 = vpop.f32.mrf.mxu2 }
 0x3c4   :  { %277 = vrot.lane.b32.xlu1 %v269_v57, %s606_s3 }
 0x3cb   :  { %v249_v58 = vpop.f32.mrf.mxu3  ;;  %v272_v18 = vpop.f32.mrf.mxu2 }
 0x3cc   :  { %316 = vperm.xlu1 %552, %v269_v57   ;;  %279 = vrot.lane.b32.xlu0 %v272_v18, %s606_s3  ;;  %v554_v57 = vld [vmem:[%s942_s5] ss:$0 sm:$0xff]  ;;  %s608_s5 = smov 128  }
 0x3cd   :  { %376 = vmatpush.msra.mxu0 %v249_v58 }
 0x3cf   :  { %377 = vmatpush.msra.mxu0 %v246_v17  ;;  %v466_v17 = vpop.f32.mrf.mxu1 }
 0x3d3   :  { %v489_v58 = vpop.f32.mrf.mxu3 }
 0x3d4   :  { %320 = vperm.xlu0 %553, %v272_v18   ;;  %v467_v18 = vadd.f32 %v554_v57, %v466_v17 }
 0x436   :  { %v278_v59 = vpop.permute.xlu1 %277 }
 0x437   :  { %283 = vxpose.xlu1.b32.start [1/2] (short) (narrow) %v278_v59, 8  ;;  %v490_v59 = vadd.f32 %v489_v58, %v467_v18 }
 0x43e   :  { %v280_v60 = vpop.permute.xlu0 %279  ;;  %v317_v61 = vpop.permute.xlu1 %316 }
 0x43f   :  { %284 = vxpose.xlu1.b32.end [2/2] (short) (narrow) %v280_v60, 8  ;;  %v469_v60 = vpop.f32.mrf.mxu1 }
 0x446   :  { %v321_v0 = vpop.permute.xlu0 %320 }
 0x4db   :  { %v299_v62 = vpop.trf.xlu1 }
 0x4dc   :  { %v323_v63 = vperm.slane %v299_v62, 0 }
 0x4de   :  { %v324_v1 = vadd.f32 %v323_v63, %v317_v61  ;;  %v325_v2 = vadd.f32 %v323_v63, %v321_v0  ;;  %v470_v63 = vadd.f32 %v554_v57, %v469_v60  ;;  %v492_v0 = vpop.f32.mrf.mxu3 }
 0x4e0   :  { %v328_v3 = vmul.f32 0.2, %v324_v1  ;;  %v329_v4 = vmul.f32 0.2, %v325_v2  ;;  %vm326_vm5 = vcmp.gt.f32.partialorder %v324_v1, 0.0  ;;  %vm327_vm6 = vcmp.gt.f32.partialorder %v325_v2, 0.0 }
 0x4e2   :  { %v330_v5 = vsel %vm326_vm5, %v324_v1, %v328_v3  ;;  %v331_v6 = vsel %vm327_vm6, %v325_v2, %v329_v4  ;;  %v493_v1 = vadd.f32 %v492_v0, %v470_v63 }
 0x4e3   :  { %v332_v7 = vadd.f32 %v330_v5, %v757_v44  ;;  %v333_v8 = vadd.f32 %v331_v6, %v752_v43 }
 0x4e5   :  { %v334_v9 = vsel %vm165_vm2, %v332_v7, -inf  ;;  %v337_v10 = vsel %vm165_vm2, %v333_v8, -inf }
 0x4e6   :  { %335 = vmax.xlane.f32.xlu0 %v334_v9  ;;  %338 = vmax.xlane.f32.xlu2 %v337_v10 }
 0x559   :  { %v339_v11 = vpop.xlane.xlu2 %338  ;;  %v336_v12 = vpop.xlane.xlu0 %335 }
 0x55a   :  { %v341_v13 = vsub.f32 %v333_v8, %v339_v11  ;;  %v340_v14 = vsub.f32 %v332_v7, %v336_v12 }
 0x55c   :  { %v344_v15 = vmul.f32 1.442695, %v341_v13  ;;  %v342_v16 = vmul.f32 1.442695, %v340_v14 }
 0x55e   :  { %567 = vpow2.f32 %v344_v15 }
 0x55f   :  { %569 = vpow2.f32 %v342_v16 }
 0x564   :  { %v568_v19 = vpop.eup %567 }
 0x565   :  { %v570_v20 = vpop.eup %569  ;;  %v349_v44 = vsel %vm165_vm2, %v568_v19, 0.0 }
 0x566   :  { %350 = vadd.xlane.f32.xlu0 %v349_v44  ;;  %v346_v43 = vsel %vm165_vm2, %v570_v20, 0.0 }
 0x567   :  { %347 = vadd.xlane.f32.xlu2 %v346_v43 }
 0x5d9   :  { %v351_v30 = vpop.xlane.xlu0 %350 }
 0x5da   :  { %v348_v29 = vpop.xlane.xlu2 %347 }
 0x5db   :  { %571 = vrcp.f32 %v348_v29 }
 0x5dc   :  { %573 = vrcp.f32 %v351_v30 }
 0x5e1   :  { %v572_v31 = vpop.eup %571 }
 0x5e2   :  { %v354_v32 = vmul.f32 %v572_v31, %v570_v20  ;;  %v574_v33 = vpop.eup %573 }
 0x5e3   :  { %v355_v34 = vmul.f32 %v574_v33, %v568_v19 }
 0x5e4   :  { %542 = vmatmul.msk.f32.vlgmr.msra.gmra.mxu0 %vm165_vm2, %v354_v32 }
 0x5ec   :  { %543 = vmatmul.msk.f32.gmra.mxu0 %vm165_vm2, %v355_v34 }
 0x661   :  { %v379_v45 = vpop.f32.mrf.mxu0 }
 0x662   :  { %v387_v46 = vmin.f32 %v379_v45, 0.0  ;;  %vm385_vm7 = vcmp.gt.f32.partialorder %v379_v45, 0.0 }
 0x664   :  { %v389_v47 = vmul.f32 1.442695, %v387_v46 }
 0x666   :  { %575 = vpow2.f32 %v389_v47 }
 0x669   :  { %v382_v48 = vpop.f32.mrf.mxu0 }
 0x66a   :  { %v388_v49 = vmin.f32 %v382_v48, 0.0  ;;  %vm386_vm8 = vcmp.gt.f32.partialorder %v382_v48, 0.0 }
 0x66c   :  { %v576_v50 = vpop.eup %575  ;;  %v391_v51 = vmul.f32 1.442695, %v388_v49 }
 0x66d   :  { %v544_v52 = vadd.f32 -1.0, %v576_v50 }
 0x66e   :  { %577 = vpow2.f32 %v391_v51 }
 0x66f   :  { %v395_v53 = vsel %vm385_vm7, %v379_v45, %v544_v52 }
 0x670   :  { %511 = vmatmul.f32.vlgmr.msrb.gmra.mxu2 %v395_v53 }
 0x674   :  { %v578_v54 = vpop.eup %577 }
 0x675   :  { %v545_v55 = vadd.f32 -1.0, %v578_v54 }
 0x677   :  { %v396_v56 = vsel %vm386_vm8, %v382_v48, %v545_v55 }
 0x678   :  { %514 = vmatmul.f32.gmra.mxu2 %v396_v56 }
 0x6f3   :  { %v512_v61 = vpop.f32.mrf.mxu2 }
 0x6f4   :  { %v513_v62 = vadd.f32 %v512_v61, %v490_v59 }
 0x6f6   :  { %518 = vst [vmem:[#allocation2] sm:$0xff] %v513_v62 }
 0x6fb   :  { %v515_v2 = vpop.f32.mrf.mxu2 }
 0x6fc   :  { %v516_v3 = vadd.f32 %v515_v2, %v493_v1 }
 0x6fe   :  { %519 = vst [vmem:[#allocation2 + $0x8] sm:$0xff] %v516_v3 }
 0x6ff   :  { %532 = dma.vmem_to_hbm [thread:$0]  %s525_s8, 256, %s527_s0, [#allocation3], %s608_s5, %s608_s5, %s609_s11  }
 0x700   :  { %603 = dma.done.wait [#allocation3], 256  }
 0x701   :  { %604 = vsyncadd [#allocation3], 4294967040 }
 0x702   :  { %537 = vsyncpa [#allocation3], 1 }

</bundles_post_ra>
